<compile_context>
chip_gen: v5e
topology: v5e:2x2
jax: 0.10.0
libtpu: 0.0.40
codegen_flags: <defaults>
</compile_context>

<pallas_src>
import functools

import jax
import jax.numpy as jnp
from jax.experimental import pallas as pl
from jax.experimental.pallas import tpu as pltpu


# ----------------------------- static structure -----------------------------

EDGE_TYPES = [
    ('value', 'w_type', 'typ'),
    ('instruction', 'dataflow', 'value'),
    ('value', 'dataflow', 'instruction'),
    ('value', 'w_attribute', 'attribute'),
    ('typ', 'w_size', 'size'),
    ('instruction', 'cfg', 'instruction'),
]

NODE_TYPES = ['value', 'typ', 'size', 'module', 'attribute', 'instruction']

# node types that actually carry features / appear in the graph
X_ORDER = ['value', 'typ', 'size', 'attribute', 'instruction']

# destination node types in HeteroConv output (dict insertion) order — this
# order defines the concat order feeding graph_lin, same as the PyTorch model.
DST_ORDER = ['typ', 'value', 'instruction', 'attribute', 'size']

G_PAD = 8      # sublane-aligned number of pooled rows (>= num_graphs)
LANE = 128     # lane width of the packed weight slab / output


def _round_up(x, m):
    return ((x + m - 1) // m) * m


# ----------------------------- packed slab layout -----------------------------

def make_layout(node_counts, feat_dims, hidden, out_channels):
    """Static row/lane offsets for the three packed input slabs."""
    lay = {}
    lay['f_pad'] = _round_up(max(feat_dims[t] for t in X_ORDER), 8)

    # feature slab: per-node-type row blocks, sublane (8) aligned
    x_off, r = {}, 0
    for t in X_ORDER:
        x_off[t] = r
        r += _round_up(node_counts[t], 8)
    lay['x_off'], lay['x_rows'] = x_off, r

    # lane layout of each node type's packed projection:
    #   [ W_l for every edge with src==t | summed W_r for edges with dst==t ]
    lsrc_col, rdst_col, max_cols = {}, {}, 0
    for t in X_ORDER:
        c = 0
        for e in EDGE_TYPES:
            if e[0] == t:
                lsrc_col[e] = c
                c += hidden
        if any(e[2] == t for e in EDGE_TYPES):
            rdst_col[t] = c
            c += hidden
        max_cols = max(max_cols, c)
    lay['lsrc_col'], lay['rdst_col'] = lsrc_col, rdst_col

    # structure slab: A_norm blocks then mean-pool blocks, lane width = max n_t
    a_off, r = {}, 0
    for e in EDGE_TYPES:
        a_off[e] = r
        r += _round_up(node_counts[e[2]], 8)
    p_off = {}
    for t in DST_ORDER:
        p_off[t] = r
        r += G_PAD
    lay['a_off'], lay['p_off'], lay['s_rows'] = a_off, p_off, r
    lay['s_cols'] = _round_up(max(node_counts[t] for t in X_ORDER), 8)

    # weight slab (one shared lane width for all blocks + the output)
    w_cols = max(_round_up(out_channels, LANE), _round_up(max_cols, LANE))
    lay['w_cols'] = w_cols
    lay['wp_off'] = {t: i * lay['f_pad'] for i, t in enumerate(X_ORDER)}
    wf_base = len(X_ORDER) * lay['f_pad']
    lay['wf_off'] = {t: wf_base + j * hidden for j, t in enumerate(DST_ORDER)}
    lay['bias_off'] = wf_base + len(DST_ORDER) * hidden   # sublane aligned
    lay['const_off'] = lay['bias_off'] + 8
    lay['w_rows'] = lay['const_off'] + G_PAD
    return lay


# ----------------------------- fused Pallas kernel -----------------------------

def _fused_forward_kernel(x_ref, s_ref, w_ref, o_ref, *, layout, node_counts,
                          hidden):
    """Entire HeteroSAGE forward: 3 packed input slabs -> [G_PAD, 128] slab."""
    H = hidden
    F = layout['f_pad']

    # Stage 1 — one lane-packed projection matmul per node type.
    # proj[t][:, c:c+H] is x_t @ W for every W_l (t as source) and the
    # dst-summed W_r (t as destination), all in a single MXU pass.
    proj = {}
    for t in X_ORDER:
        xo = layout['x_off'][t]
        wo = layout['wp_off'][t]
        proj[t] = jnp.dot(x_ref[xo:xo + node_counts[t], :],
                          w_ref[wo:wo + F, :],
                          preferred_element_type=jnp.float32)

    # per-dst SAGE biases (row j = summed b_l for DST_ORDER[j])
    bias_all = w_ref[layout['bias_off']:layout['bias_off'] + 8, 0:H]
    # graph_lin bias + pooled node_lin biases, precomputed as a constant slab
    g = w_ref[layout['const_off']:layout['const_off'] + G_PAD, :]

    # Stage 2 — per destination type: HeteroConv sum -> relu -> mean-pool ->
    # (node_lin @ graph_lin)-fused projection accumulated straight into g.
    for j, t in enumerate(DST_ORDER):
        n_dst = node_counts[t]
        rc = layout['rdst_col'][t]
        acc = proj[t][:, rc:rc + H] + bias_all[j:j + 1, :]        # root + bias
        for e in EDGE_TYPES:
            if e[2] != t:
                continue
            src = e[0]
            lc = layout['lsrc_col'][e]
            a = s_ref[layout['a_off'][e]:layout['a_off'][e] + n_dst,
                      0:node_counts[src]]
            acc = acc + jnp.dot(a, proj[src][:, lc:lc + H],
                                preferred_element_type=jnp.float32)
        h_t = jnp.maximum(acc, 0.0)                               # relu
        po = layout['p_off'][t]
        pooled = jnp.dot(s_ref[po:po + G_PAD, 0:n_dst], h_t,
                         preferred_element_type=jnp.float32)      # [G_PAD, H]
        wfo = layout['wf_off'][t]
        g = g + jnp.dot(pooled, w_ref[wfo:wfo + H, :],
                        preferred_element_type=jnp.float32)

    o_ref[...] = g


# ----------------------------- forward wrapper -----------------------------

def hetero_sage_forward(w_slab, s_slab, x, *, layout, node_counts, feat_dims,
                        hidden, num_graphs, out_channels):
    # pack node features into one [x_rows, f_pad] slab (cheap XLA pad/updates)
    x_slab = jnp.zeros((layout['x_rows'], layout['f_pad']), jnp.float32)
    for t in X_ORDER:
        xo = layout['x_off'][t]
        x_slab = x_slab.at[xo:xo + node_counts[t], 0:feat_dims[t]].set(
            x[t].astype(jnp.float32))

    # advisory cost estimate (keeps XLA from mis-scheduling the custom call)
    flops = 0
    for t in X_ORDER:
        flops += 2 * node_counts[t] * layout['f_pad'] * layout['w_cols']
    for e in EDGE_TYPES:
        flops += 2 * node_counts[e[2]] * node_counts[e[0]] * hidden
    for t in DST_ORDER:
        flops += 2 * G_PAD * node_counts[t] * hidden
        flops += 2 * G_PAD * hidden * layout['w_cols']
    bytes_accessed = 4 * (x_slab.size + s_slab.size + w_slab.size
                          + G_PAD * layout['w_cols'])

    kernel = functools.partial(_fused_forward_kernel, layout=layout,
                               node_counts=node_counts, hidden=hidden)
    vmem = pl.BlockSpec(memory_space=pltpu.MemorySpace.VMEM)
    # NOTE: whole-array, no-grid design. Total VMEM footprint here is <200 KiB
    # so it fits all generations; if node counts grow into the thousands the
    # dense A_norm blocks must move to a grid over dst-node tiles with
    # BlockSpec'd rows + pltpu.CompilerParams(vmem_limit_bytes=...) (v7x has
    # only 64 MiB VMEM).
    out = pl.pallas_call(
        kernel,
        out_shape=jax.ShapeDtypeStruct((G_PAD, layout['w_cols']), jnp.float32),
        in_specs=[vmem, vmem, vmem],
        out_specs=vmem,
        cost_estimate=pl.CostEstimate(flops=flops, transcendentals=0,
                                      bytes_accessed=bytes_accessed),
    )(x_slab, s_slab, w_slab)
    return out[:num_graphs, :out_channels]


# ----------------------------- graph-structure constants -----------------------------

def build_structure(edge_index, batch, node_counts):
    """Row-normalized dense adjacency + mean-pool matrices (topology only).

    Built once, outside the per-forward path, with one-hot matmuls (no XLA
    scatter-add). Duplicate edges keep their multiplicity in both numerator
    and denominator (PyG scatter-mean semantics).
    """
    a_norms = {}
    for et in EDGE_TYPES:
        src_t, _, dst_t = et
        src, dst = edge_index[et][0], edge_index[et][1]
        n_src, n_dst = node_counts[src_t], node_counts[dst_t]
        dst_oh = (dst[None, :] == jnp.arange(n_dst)[:, None]).astype(jnp.float32)
        src_oh = (src[None, :] == jnp.arange(n_src)[:, None]).astype(jnp.float32)
        adj = dst_oh @ src_oh.T
        deg = jnp.maximum(adj.sum(axis=1, keepdims=True), 1.0)
        a_norms[et] = adj / deg                       # mean aggregation
    pools = {}
    for nt in DST_ORDER:
        b = batch[nt]
        oh = (jnp.arange(G_PAD)[:, None] == b[None, :]).astype(jnp.float32)
        cnt = jnp.maximum(oh.sum(axis=1, keepdims=True), 1.0)
        pools[nt] = oh / cnt                          # rows >= num_graphs: zero
    return a_norms, pools


def pack_structure(a_norms, pools, layout, node_counts):
    """All A_norm and pool matrices in one [s_rows, s_cols] slab (one DMA)."""
    S = jnp.zeros((layout['s_rows'], layout['s_cols']), jnp.float32)
    for e in EDGE_TYPES:
        r0 = layout['a_off'][e]
        n_dst, n_src = node_counts[e[2]], node_counts[e[0]]
        S = S.at[r0:r0 + n_dst, 0:n_src].set(a_norms[e])
    for t in DST_ORDER:
        r0 = layout['p_off'][t]
        S = S.at[r0:r0 + G_PAD, 0:node_counts[t]].set(pools[t])
    return S


def pack_params(params, pools, layout, node_counts, feat_dims, hidden,
                out_channels):
    """Every weight/bias/constant the kernel needs, in one [w_rows, 128] slab.

    Includes the offline algebraic folds:
      * W_r / b_l pre-summed over edge types sharing a destination,
      * node_lin folded into graph_lin (W_fused_t = W_node_t @ W_graph_t),
      * node_lin biases + graph_lin bias absorbed into a constant [G_PAD, .]
        slab using rowsum(pool_t).
    """
    del node_counts  # layout already encodes everything row-count dependent
    H = hidden
    W = jnp.zeros((layout['w_rows'], layout['w_cols']), jnp.float32)

    # stage-1 packed projection weights
    for t in X_ORDER:
        r0 = layout['wp_off'][t]
        f = feat_dims[t]
        for e in EDGE_TYPES:
            if e[0] == t:
                c = layout['lsrc_col'][e]
                W = W.at[r0:r0 + f, c:c + H].set(params['conv1'][e]['wl'])
        wr_sum = None
        for e in EDGE_TYPES:
            if e[2] == t:
                wr = params['conv1'][e]['wr']
                wr_sum = wr if wr_sum is None else wr_sum + wr
        if wr_sum is not None:
            c = layout['rdst_col'][t]
            W = W.at[r0:r0 + f, c:c + H].set(wr_sum)

    # fused (node_lin @ graph_lin) blocks, per-dst SAGE biases, constant slab
    wg = params['graph_lin']['w']                       # [5H, out_channels]
    const = jnp.broadcast_to(params['graph_lin']['b'],
                             (G_PAD, out_channels)).astype(jnp.float32)
    for j, t in enumerate(DST_ORDER):
        wn, bn = params['node_lin'][t]
        wg_t = wg[j * H:(j + 1) * H, :]
        r0 = layout['wf_off'][t]
        W = W.at[r0:r0 + H, 0:out_channels].set(wn @ wg_t)
        bl_sum = None
        for e in EDGE_TYPES:
            if e[2] == t:
                bl = params['conv1'][e]['bl']
                bl_sum = bl if bl_sum is None else bl_sum + bl
        W = W.at[layout['bias_off'] + j, 0:H].set(bl_sum[0])
        rs = pools[t].sum(axis=1)        # 1 for graphs with nodes of type t
        const = const + rs[:, None] * (bn @ wg_t)
    W = W.at[layout['const_off']:layout['const_off'] + G_PAD,
             0:out_channels].set(const)
    return W


# ----------------------------- param init -----------------------------

def init_params(key, feat_dims, hidden, out_channels):
    params = {'conv1': {}, 'node_lin': {}, 'graph_lin': {}}
    keys = jax.random.split(key, 64)
    ki = 0

    def nk():
        nonlocal ki
        k = keys[ki]
        ki += 1
        return k

    for et in EDGE_TYPES:
        src_t, _, dst_t = et
        params['conv1'][et] = {
            'wl': 0.1 * jax.random.normal(nk(), (feat_dims[src_t], hidden), jnp.float32),
            'bl': 0.1 * jax.random.normal(nk(), (1, hidden), jnp.float32),
            'wr': 0.1 * jax.random.normal(nk(), (feat_dims[dst_t], hidden), jnp.float32),
        }
    # NOTE: node_lin['module'] is defined for parity with the PyTorch module
    # but is never applied ('module' never appears as a destination type).
    for nt in NODE_TYPES:
        params['node_lin'][nt] = (
            0.1 * jax.random.normal(nk(), (hidden, hidden), jnp.float32),
            0.1 * jax.random.normal(nk(), (1, hidden), jnp.float32),
        )
    params['graph_lin'] = {
        'w': 0.1 * jax.random.normal(nk(), (hidden * 5, out_channels), jnp.float32),
        'b': 0.1 * jax.random.normal(nk(), (1, out_channels), jnp.float32),
    }
    return params


# ----------------------------- pure-JAX reference -----------------------------

def reference_forward(params, x, a_norms, pools, num_graphs):
    h = {}
    for et in EDGE_TYPES:
        src_t, _, dst_t = et
        p = params['conv1'][et]
        upd = a_norms[et] @ (x[src_t] @ p['wl']) + x[dst_t] @ p['wr'] + p['bl']
        h[dst_t] = upd if dst_t not in h else h[dst_t] + upd
    pooled = []
    for t in DST_ORDER:
        wn, bn = params['node_lin'][t]
        y = jnp.maximum(h[t], 0.0) @ wn + bn
        pooled.append(pools[t][:num_graphs] @ y)
    z = jnp.concatenate(pooled, axis=-1)
    return z @ params['graph_lin']['w'] + params['graph_lin']['b']


# ----------------------------- main -----------------------------

if __name__ == "__main__":
    hidden_channels = 32
    out_channels = 8
    num_graphs = 2       # G_PAD=8 rows available: batch more graphs per launch

    node_counts = {'value': 16, 'typ': 8, 'size': 8,
                   'attribute': 8, 'instruction': 16}
    feat_dims = {'value': 12, 'typ': 6, 'size': 5, 'module': 4,
                 'attribute': 7, 'instruction': 10}

    key = jax.random.PRNGKey(0)
    k_param, k_feat, k_edge = jax.random.split(key, 3)
    params = init_params(k_param, feat_dims, hidden_channels, out_channels)

    # node features
    x = {}
    fkeys = jax.random.split(k_feat, len(node_counts))
    for fk, (nt, n) in zip(fkeys, node_counts.items()):
        x[nt] = jax.random.normal(fk, (n, feat_dims[nt]), jnp.float32)

    # edges (random, 24 per edge type)
    edge_index = {}
    ekeys = jax.random.split(k_edge, len(EDGE_TYPES))
    num_edges = 24
    for ek, et in zip(ekeys, EDGE_TYPES):
        src_t, _, dst_t = et
        ks, kd = jax.random.split(ek)
        src = jax.random.randint(ks, (num_edges,), 0, node_counts[src_t], jnp.int32)
        dst = jax.random.randint(kd, (num_edges,), 0, node_counts[dst_t], jnp.int32)
        edge_index[et] = jnp.stack([src, dst], axis=0)

    # batch assignment: first half of each node set -> graph 0, rest -> graph 1
    batch = {nt: (jnp.arange(n) >= n // 2).astype(jnp.int32)
             for nt, n in node_counts.items()}

    # one-time precompute: structure constants + packed slabs (outside forward)
    layout = make_layout(node_counts, feat_dims, hidden_channels, out_channels)
    a_norms, pools = build_structure(edge_index, batch, node_counts)
    s_slab = pack_structure(a_norms, pools, layout, node_counts)
    w_slab = pack_params(params, pools, layout, node_counts, feat_dims,
                         hidden_channels, out_channels)

    fwd = jax.jit(functools.partial(hetero_sage_forward,
                                    layout=layout,
                                    node_counts=node_counts,
                                    feat_dims=feat_dims,
                                    hidden=hidden_channels,
                                    num_graphs=num_graphs,
                                    out_channels=out_channels))
    out = jax.block_until_ready(fwd(w_slab, s_slab, x))
    assert out.shape == (num_graphs, out_channels)

    # correctness sanity check vs an unfused pure-JAX reference (loose tol:
    # MXU default precision + offline weight folds reassociate the math)
    ref = jax.block_until_ready(reference_forward(params, x, a_norms, pools,
                                                  num_graphs))
    assert jnp.allclose(out, ref, rtol=5e-2, atol=2e-2), (out, ref)
    print("KERNEL_OK")
</pallas_src>

<mosaic_0001>
module attributes {stable_mosaic.version = 11 : i64} {
  func.func @_fused_forward_kernel(%arg0: memref<56x16xf32, #tpu.memory_space<vmem>>, %arg1: memref<112x16xf32, #tpu.memory_space<vmem>>, %arg2: memref<256x128xf32, #tpu.memory_space<vmem>>, %arg3: memref<8x128xf32, #tpu.memory_space<vmem>>) attributes {dimension_semantics = [], scalar_prefetch = 0 : i64, scratch_operands = 0 : i64, tpu.core_type = #tpu.core_type<tc>} {
    %c0 = arith.constant 0 : index
    %c0_0 = arith.constant 0 : index
    %0 = vector.load %arg0[%c0, %c0_0] : memref<56x16xf32, #tpu.memory_space<vmem>>, vector<16x16xf32>
    %c0_1 = arith.constant 0 : index
    %c0_2 = arith.constant 0 : index
    %1 = vector.load %arg2[%c0_1, %c0_2] : memref<256x128xf32, #tpu.memory_space<vmem>>, vector<16x128xf32>
    %cst = arith.constant dense<0.000000e+00> : vector<16x128xf32>
    %2 = tpu.matmul %0, %1, %cst {dimension_numbers = #tpu.dot_dimension_numbers<[1], [0], [0], [1], [0, 0, 1, 1], [], []>} : vector<16x16xf32>, vector<16x128xf32>, vector<16x128xf32> -> vector<16x128xf32>
    %c16 = arith.constant 16 : index
    %c0_3 = arith.constant 0 : index
    %3 = vector.load %arg0[%c16, %c0_3] : memref<56x16xf32, #tpu.memory_space<vmem>>, vector<8x16xf32>
    %c16_4 = arith.constant 16 : index
    %c0_5 = arith.constant 0 : index
    %4 = vector.load %arg2[%c16_4, %c0_5] : memref<256x128xf32, #tpu.memory_space<vmem>>, vector<16x128xf32>
    %cst_6 = arith.constant dense<0.000000e+00> : vector<8x128xf32>
    %5 = tpu.matmul %3, %4, %cst_6 {dimension_numbers = #tpu.dot_dimension_numbers<[1], [0], [0], [1], [0, 0, 1, 1], [], []>} : vector<8x16xf32>, vector<16x128xf32>, vector<8x128xf32> -> vector<8x128xf32>
    %c24 = arith.constant 24 : index
    %c0_7 = arith.constant 0 : index
    %6 = vector.load %arg0[%c24, %c0_7] : memref<56x16xf32, #tpu.memory_space<vmem>>, vector<8x16xf32>
    %c32 = arith.constant 32 : index
    %c0_8 = arith.constant 0 : index
    %7 = vector.load %arg2[%c32, %c0_8] : memref<256x128xf32, #tpu.memory_space<vmem>>, vector<16x128xf32>
    %cst_9 = arith.constant dense<0.000000e+00> : vector<8x128xf32>
    %8 = tpu.matmul %6, %7, %cst_9 {dimension_numbers = #tpu.dot_dimension_numbers<[1], [0], [0], [1], [0, 0, 1, 1], [], []>} : vector<8x16xf32>, vector<16x128xf32>, vector<8x128xf32> -> vector<8x128xf32>
    %c32_10 = arith.constant 32 : index
    %c0_11 = arith.constant 0 : index
    %9 = vector.load %arg0[%c32_10, %c0_11] : memref<56x16xf32, #tpu.memory_space<vmem>>, vector<8x16xf32>
    %c48 = arith.constant 48 : index
    %c0_12 = arith.constant 0 : index
    %10 = vector.load %arg2[%c48, %c0_12] : memref<256x128xf32, #tpu.memory_space<vmem>>, vector<16x128xf32>
    %cst_13 = arith.constant dense<0.000000e+00> : vector<8x128xf32>
    %11 = tpu.matmul %9, %10, %cst_13 {dimension_numbers = #tpu.dot_dimension_numbers<[1], [0], [0], [1], [0, 0, 1, 1], [], []>} : vector<8x16xf32>, vector<16x128xf32>, vector<8x128xf32> -> vector<8x128xf32>
    %c40 = arith.constant 40 : index
    %c0_14 = arith.constant 0 : index
    %12 = vector.load %arg0[%c40, %c0_14] : memref<56x16xf32, #tpu.memory_space<vmem>>, vector<16x16xf32>
    %c64 = arith.constant 64 : index
    %c0_15 = arith.constant 0 : index
    %13 = vector.load %arg2[%c64, %c0_15] : memref<256x128xf32, #tpu.memory_space<vmem>>, vector<16x128xf32>
    %cst_16 = arith.constant dense<0.000000e+00> : vector<16x128xf32>
    %14 = tpu.matmul %12, %13, %cst_16 {dimension_numbers = #tpu.dot_dimension_numbers<[1], [0], [0], [1], [0, 0, 1, 1], [], []>} : vector<16x16xf32>, vector<16x128xf32>, vector<16x128xf32> -> vector<16x128xf32>
    %c240 = arith.constant 240 : index
    %c0_17 = arith.constant 0 : index
    %15 = vector.load %arg2[%c240, %c0_17] : memref<256x128xf32, #tpu.memory_space<vmem>>, vector<8x32xf32>
    %c248 = arith.constant 248 : index
    %c0_18 = arith.constant 0 : index
    %16 = vector.load %arg2[%c248, %c0_18] : memref<256x128xf32, #tpu.memory_space<vmem>>, vector<8x128xf32>
    %17 = vector.extract_strided_slice %5 {offsets = [0, 32], sizes = [8, 32], strides = [1, 1]} : vector<8x128xf32> to vector<8x32xf32>
    %18 = vector.extract_strided_slice %15 {offsets = [0, 0], sizes = [1, 32], strides = [1, 1]} : vector<8x32xf32> to vector<1x32xf32>
    %19 = vector.broadcast %18 : vector<1x32xf32> to vector<8x32xf32>
    %20 = arith.addf %17, %19 : vector<8x32xf32>
    %c0_19 = arith.constant 0 : index
    %c0_20 = arith.constant 0 : index
    %21 = vector.load %arg1[%c0_19, %c0_20] : memref<112x16xf32, #tpu.memory_space<vmem>>, vector<8x16xf32>
    %22 = vector.extract_strided_slice %2 {offsets = [0, 0], sizes = [16, 32], strides = [1, 1]} : vector<16x128xf32> to vector<16x32xf32>
    %cst_21 = arith.constant dense<0.000000e+00> : vector<8x32xf32>
    %23 = tpu.matmul %21, %22, %cst_21 {dimension_numbers = #tpu.dot_dimension_numbers<[1], [0], [0], [1], [0, 0, 1, 1], [], []>} : vector<8x16xf32>, vector<16x32xf32>, vector<8x32xf32> -> vector<8x32xf32>
    %24 = arith.addf %20, %23 : vector<8x32xf32>
    %cst_22 = arith.constant 0.000000e+00 : f32
    %25 = vector.broadcast %cst_22 : f32 to vector<8x32xf32>
    %26 = arith.maximumf %24, %25 : vector<8x32xf32>
    %c72 = arith.constant 72 : index
    %c0_23 = arith.constant 0 : index
    %27 = vector.load %arg1[%c72, %c0_23] : memref<112x16xf32, #tpu.memory_space<vmem>>, vector<8x8xf32>
    %cst_24 = arith.constant dense<0.000000e+00> : vector<8x32xf32>
    %28 = tpu.matmul %27, %26, %cst_24 {dimension_numbers = #tpu.dot_dimension_numbers<[1], [0], [0], [1], [0, 0, 1, 1], [], []>} : vector<8x8xf32>, vector<8x32xf32>, vector<8x32xf32> -> vector<8x32xf32>
    %c80 = arith.constant 80 : index
    %c0_25 = arith.constant 0 : index
    %29 = vector.load %arg2[%c80, %c0_25] : memref<256x128xf32, #tpu.memory_space<vmem>>, vector<32x128xf32>
    %cst_26 = arith.constant dense<0.000000e+00> : vector<8x128xf32>
    %30 = tpu.matmul %28, %29, %cst_26 {dimension_numbers = #tpu.dot_dimension_numbers<[1], [0], [0], [1], [0, 0, 1, 1], [], []>} : vector<8x32xf32>, vector<32x128xf32>, vector<8x128xf32> -> vector<8x128xf32>
    %31 = arith.addf %16, %30 : vector<8x128xf32>
    %32 = vector.extract_strided_slice %2 {offsets = [0, 96], sizes = [16, 32], strides = [1, 1]} : vector<16x128xf32> to vector<16x32xf32>
    %33 = vector.extract_strided_slice %15 {offsets = [1, 0], sizes = [1, 32], strides = [1, 1]} : vector<8x32xf32> to vector<1x32xf32>
    %34 = vector.broadcast %33 : vector<1x32xf32> to vector<16x32xf32>
    %35 = arith.addf %32, %34 : vector<16x32xf32>
    %c8 = arith.constant 8 : index
    %c0_27 = arith.constant 0 : index
    %36 = vector.load %arg1[%c8, %c0_27] : memref<112x16xf32, #tpu.memory_space<vmem>>, vector<16x16xf32>
    %37 = vector.extract_strided_slice %14 {offsets = [0, 0], sizes = [16, 32], strides = [1, 1]} : vector<16x128xf32> to vector<16x32xf32>
    %cst_28 = arith.constant dense<0.000000e+00> : vector<16x32xf32>
    %38 = tpu.matmul %36, %37, %cst_28 {dimension_numbers = #tpu.dot_dimension_numbers<[1], [0], [0], [1], [0, 0, 1, 1], [], []>} : vector<16x16xf32>, vector<16x32xf32>, vector<16x32xf32> -> vector<16x32xf32>
    %39 = arith.addf %35, %38 : vector<16x32xf32>
    %cst_29 = arith.constant 0.000000e+00 : f32
    %40 = vector.broadcast %cst_29 : f32 to vector<16x32xf32>
    %41 = arith.maximumf %39, %40 : vector<16x32xf32>
    %c80_30 = arith.constant 80 : index
    %c0_31 = arith.constant 0 : index
    %42 = vector.load %arg1[%c80_30, %c0_31] : memref<112x16xf32, #tpu.memory_space<vmem>>, vector<8x16xf32>
    %cst_32 = arith.constant dense<0.000000e+00> : vector<8x32xf32>
    %43 = tpu.matmul %42, %41, %cst_32 {dimension_numbers = #tpu.dot_dimension_numbers<[1], [0], [0], [1], [0, 0, 1, 1], [], []>} : vector<8x16xf32>, vector<16x32xf32>, vector<8x32xf32> -> vector<8x32xf32>
    %c112 = arith.constant 112 : index
    %c0_33 = arith.constant 0 : index
    %44 = vector.load %arg2[%c112, %c0_33] : memref<256x128xf32, #tpu.memory_space<vmem>>, vector<32x128xf32>
    %cst_34 = arith.constant dense<0.000000e+00> : vector<8x128xf32>
    %45 = tpu.matmul %43, %44, %cst_34 {dimension_numbers = #tpu.dot_dimension_numbers<[1], [0], [0], [1], [0, 0, 1, 1], [], []>} : vector<8x32xf32>, vector<32x128xf32>, vector<8x128xf32> -> vector<8x128xf32>
    %46 = arith.addf %31, %45 : vector<8x128xf32>
    %47 = vector.extract_strided_slice %14 {offsets = [0, 64], sizes = [16, 32], strides = [1, 1]} : vector<16x128xf32> to vector<16x32xf32>
    %48 = vector.extract_strided_slice %15 {offsets = [2, 0], sizes = [1, 32], strides = [1, 1]} : vector<8x32xf32> to vector<1x32xf32>
    %49 = vector.broadcast %48 : vector<1x32xf32> to vector<16x32xf32>
    %50 = arith.addf %47, %49 : vector<16x32xf32>
    %c24_35 = arith.constant 24 : index
    %c0_36 = arith.constant 0 : index
    %51 = vector.load %arg1[%c24_35, %c0_36] : memref<112x16xf32, #tpu.memory_space<vmem>>, vector<16x16xf32>
    %52 = vector.extract_strided_slice %2 {offsets = [0, 32], sizes = [16, 32], strides = [1, 1]} : vector<16x128xf32> to vector<16x32xf32>
    %cst_37 = arith.constant dense<0.000000e+00> : vector<16x32xf32>
    %53 = tpu.matmul %51, %52, %cst_37 {dimension_numbers = #tpu.dot_dimension_numbers<[1], [0], [0], [1], [0, 0, 1, 1], [], []>} : vector<16x16xf32>, vector<16x32xf32>, vector<16x32xf32> -> vector<16x32xf32>
    %54 = arith.addf %50, %53 : vector<16x32xf32>
    %c56 = arith.constant 56 : index
    %c0_38 = arith.constant 0 : index
    %55 = vector.load %arg1[%c56, %c0_38] : memref<112x16xf32, #tpu.memory_space<vmem>>, vector<16x16xf32>
    %56 = vector.extract_strided_slice %14 {offsets = [0, 32], sizes = [16, 32], strides = [1, 1]} : vector<16x128xf32> to vector<16x32xf32>
    %cst_39 = arith.constant dense<0.000000e+00> : vector<16x32xf32>
    %57 = tpu.matmul %55, %56, %cst_39 {dimension_numbers = #tpu.dot_dimension_numbers<[1], [0], [0], [1], [0, 0, 1, 1], [], []>} : vector<16x16xf32>, vector<16x32xf32>, vector<16x32xf32> -> vector<16x32xf32>
    %58 = arith.addf %54, %57 : vector<16x32xf32>
    %cst_40 = arith.constant 0.000000e+00 : f32
    %59 = vector.broadcast %cst_40 : f32 to vector<16x32xf32>
    %60 = arith.maximumf %58, %59 : vector<16x32xf32>
    %c88 = arith.constant 88 : index
    %c0_41 = arith.constant 0 : index
    %61 = vector.load %arg1[%c88, %c0_41] : memref<112x16xf32, #tpu.memory_space<vmem>>, vector<8x16xf32>
    %cst_42 = arith.constant dense<0.000000e+00> : vector<8x32xf32>
    %62 = tpu.matmul %61, %60, %cst_42 {dimension_numbers = #tpu.dot_dimension_numbers<[1], [0], [0], [1], [0, 0, 1, 1], [], []>} : vector<8x16xf32>, vector<16x32xf32>, vector<8x32xf32> -> vector<8x32xf32>
    %c144 = arith.constant 144 : index
    %c0_43 = arith.constant 0 : index
    %63 = vector.load %arg2[%c144, %c0_43] : memref<256x128xf32, #tpu.memory_space<vmem>>, vector<32x128xf32>
    %cst_44 = arith.constant dense<0.000000e+00> : vector<8x128xf32>
    %64 = tpu.matmul %62, %63, %cst_44 {dimension_numbers = #tpu.dot_dimension_numbers<[1], [0], [0], [1], [0, 0, 1, 1], [], []>} : vector<8x32xf32>, vector<32x128xf32>, vector<8x128xf32> -> vector<8x128xf32>
    %65 = arith.addf %46, %64 : vector<8x128xf32>
    %66 = vector.extract_strided_slice %11 {offsets = [0, 0], sizes = [8, 32], strides = [1, 1]} : vector<8x128xf32> to vector<8x32xf32>
    %67 = vector.extract_strided_slice %15 {offsets = [3, 0], sizes = [1, 32], strides = [1, 1]} : vector<8x32xf32> to vector<1x32xf32>
    %68 = vector.broadcast %67 : vector<1x32xf32> to vector<8x32xf32>
    %69 = arith.addf %66, %68 : vector<8x32xf32>
    %c40_45 = arith.constant 40 : index
    %c0_46 = arith.constant 0 : index
    %70 = vector.load %arg1[%c40_45, %c0_46] : memref<112x16xf32, #tpu.memory_space<vmem>>, vector<8x16xf32>
    %71 = vector.extract_strided_slice %2 {offsets = [0, 64], sizes = [16, 32], strides = [1, 1]} : vector<16x128xf32> to vector<16x32xf32>
    %cst_47 = arith.constant dense<0.000000e+00> : vector<8x32xf32>
    %72 = tpu.matmul %70, %71, %cst_47 {dimension_numbers = #tpu.dot_dimension_numbers<[1], [0], [0], [1], [0, 0, 1, 1], [], []>} : vector<8x16xf32>, vector<16x32xf32>, vector<8x32xf32> -> vector<8x32xf32>
    %73 = arith.addf %69, %72 : vector<8x32xf32>
    %cst_48 = arith.constant 0.000000e+00 : f32
    %74 = vector.broadcast %cst_48 : f32 to vector<8x32xf32>
    %75 = arith.maximumf %73, %74 : vector<8x32xf32>
    %c96 = arith.constant 96 : index
    %c0_49 = arith.constant 0 : index
    %76 = vector.load %arg1[%c96, %c0_49] : memref<112x16xf32, #tpu.memory_space<vmem>>, vector<8x8xf32>
    %cst_50 = arith.constant dense<0.000000e+00> : vector<8x32xf32>
    %77 = tpu.matmul %76, %75, %cst_50 {dimension_numbers = #tpu.dot_dimension_numbers<[1], [0], [0], [1], [0, 0, 1, 1], [], []>} : vector<8x8xf32>, vector<8x32xf32>, vector<8x32xf32> -> vector<8x32xf32>
    %c176 = arith.constant 176 : index
    %c0_51 = arith.constant 0 : index
    %78 = vector.load %arg2[%c176, %c0_51] : memref<256x128xf32, #tpu.memory_space<vmem>>, vector<32x128xf32>
    %cst_52 = arith.constant dense<0.000000e+00> : vector<8x128xf32>
    %79 = tpu.matmul %77, %78, %cst_52 {dimension_numbers = #tpu.dot_dimension_numbers<[1], [0], [0], [1], [0, 0, 1, 1], [], []>} : vector<8x32xf32>, vector<32x128xf32>, vector<8x128xf32> -> vector<8x128xf32>
    %80 = arith.addf %65, %79 : vector<8x128xf32>
    %81 = vector.extract_strided_slice %8 {offsets = [0, 0], sizes = [8, 32], strides = [1, 1]} : vector<8x128xf32> to vector<8x32xf32>
    %82 = vector.extract_strided_slice %15 {offsets = [4, 0], sizes = [1, 32], strides = [1, 1]} : vector<8x32xf32> to vector<1x32xf32>
    %83 = vector.broadcast %82 : vector<1x32xf32> to vector<8x32xf32>
    %84 = arith.addf %81, %83 : vector<8x32xf32>
    %c48_53 = arith.constant 48 : index
    %c0_54 = arith.constant 0 : index
    %85 = vector.load %arg1[%c48_53, %c0_54] : memref<112x16xf32, #tpu.memory_space<vmem>>, vector<8x8xf32>
    %86 = vector.extract_strided_slice %5 {offsets = [0, 0], sizes = [8, 32], strides = [1, 1]} : vector<8x128xf32> to vector<8x32xf32>
    %cst_55 = arith.constant dense<0.000000e+00> : vector<8x32xf32>
    %87 = tpu.matmul %85, %86, %cst_55 {dimension_numbers = #tpu.dot_dimension_numbers<[1], [0], [0], [1], [0, 0, 1, 1], [], []>} : vector<8x8xf32>, vector<8x32xf32>, vector<8x32xf32> -> vector<8x32xf32>
    %88 = arith.addf %84, %87 : vector<8x32xf32>
    %cst_56 = arith.constant 0.000000e+00 : f32
    %89 = vector.broadcast %cst_56 : f32 to vector<8x32xf32>
    %90 = arith.maximumf %88, %89 : vector<8x32xf32>
    %c104 = arith.constant 104 : index
    %c0_57 = arith.constant 0 : index
    %91 = vector.load %arg1[%c104, %c0_57] : memref<112x16xf32, #tpu.memory_space<vmem>>, vector<8x8xf32>
    %cst_58 = arith.constant dense<0.000000e+00> : vector<8x32xf32>
    %92 = tpu.matmul %91, %90, %cst_58 {dimension_numbers = #tpu.dot_dimension_numbers<[1], [0], [0], [1], [0, 0, 1, 1], [], []>} : vector<8x8xf32>, vector<8x32xf32>, vector<8x32xf32> -> vector<8x32xf32>
    %c208 = arith.constant 208 : index
    %c0_59 = arith.constant 0 : index
    %93 = vector.load %arg2[%c208, %c0_59] : memref<256x128xf32, #tpu.memory_space<vmem>>, vector<32x128xf32>
    %cst_60 = arith.constant dense<0.000000e+00> : vector<8x128xf32>
    %94 = tpu.matmul %92, %93, %cst_60 {dimension_numbers = #tpu.dot_dimension_numbers<[1], [0], [0], [1], [0, 0, 1, 1], [], []>} : vector<8x32xf32>, vector<32x128xf32>, vector<8x128xf32> -> vector<8x128xf32>
    %95 = arith.addf %80, %94 : vector<8x128xf32>
    %c0_61 = arith.constant 0 : index
    %c0_62 = arith.constant 0 : index
    %96 = vector.load %arg3[%c0_61, %c0_62] : memref<8x128xf32, #tpu.memory_space<vmem>>, vector<8x128xf32>
    tpu.vector_store %arg3[%c0_61, %c0_62], %95 {strides = array<i32>} : memref<8x128xf32, #tpu.memory_space<vmem>>, vector<8x128xf32>,
    return
  }
}

</mosaic_0001>

<bundles_post_ra>
// kernel: hetero_sage_forward.1
= control target key start
LH: loop header
LB: loop body
LE: loop exit
PB: predicated region body
PF: predicated region fallthrough
CT: control target
= control target key end

     0   :  { %vm18_vm0 = vcmask 130048   ;;  %s757_s30 = smov 96   ;;  %s758_s4 = smov 32   ;;  %vm202_vm1 = vcmask 64512   ;;  %vm230_vm2 = vcmask 261120   ;;  %s1015_s2 = inlined_call_operand.vmem [shape: f32[256,128], index: 2, kind: input, shape index: {}]   ;;  %s1016_s0 = inlined_call_operand.vmem [shape: f32[56,16], index: 0, kind: input, shape index: {}]   ;;  %s1017_s1 = inlined_call_operand.vmem [shape: f32[112,16], index: 1, kind: input, shape index: {}]   ;;  %s1018_s3 = inlined_call_operand.vmem [shape: f32[8,128], index: 3, kind: output, shape index: {}]  }
   0x1   :  { %v17_v0 = vld [vmem:[%s1015_s2 + $0x8] sm:$0xff]  ;;  %v50_v1 = vld [vmem:[%s1015_s2 + $0x18] sm:$0xff]  ;;  %v16_v2 = vld [vmem:[%s1015_s2] sm:$0xff]  ;;  %s759_s27 = smov 64  }
   0x2   :  { %39 = vmatpush.msra.mxu0 %v17_v0  ;;  %68 = vmatpush.msra.mxu1 %v50_v1  ;;  %v49_v3 = vld [vmem:[%s1015_s2 + $0x10] sm:$0xff]  ;;  %v14_v4 = vld [vmem:[%s1016_s0] sm:$0xff]  ;;  %v129_v6 = vld [vmem:[%s1015_s2 + $0x48] sm:$0xff] }
   0x3   :  { %v48_v5 = vld [vmem:[%s1016_s0 + $0x10] sm:$0xff]  ;;  %v128_v8 = vld [vmem:[%s1015_s2 + $0x40] sm:$0xff]  ;;  %v15_v11 = vld [vmem:[%s1016_s0 + $0x8] sm:$0xff] }
   0x4   :  { %40 = vmatpush.msra.mxu0 %v16_v2  ;;  %69 = vmatpush.msra.mxu1 %v49_v3  ;;  %v804_v7 = vld [vmem:[%s1015_s2 + $0xf0] sm:$0xff]  ;;  %v126_v12 = vld [vmem:[%s1016_s0 + $0x28] sm:$0xff]  ;;  %v75_v15 = vld [vmem:[%s1015_s2 + $0x20] sm:$0xff] }
   0x5   :  { %703 = vmatmul.msk.f32.vlgmr.msra.gmra.mxu0 %vm18_vm0, %v14_v4  ;;  %705 = vmatmul.msk.f32.vlgmr.msra.gmra.mxu1 %vm18_vm0, %v48_v5  ;;  %v255_v9 = vperm.slane %v804_v7, 1  ;;  %v161_v10 = vperm.slane %v804_v7, 0  ;;  %v127_v13 = vld [vmem:[%s1016_s0 + $0x30] sm:$0xff]  ;;  %v76_v14 = vld [vmem:[%s1015_s2 + $0x28] sm:$0xff]  ;;  %v74_v16 = vld [vmem:[%s1016_s0 + $0x18] sm:$0xff]  ;;  %v365_v48 = vperm.slane %v804_v7, 2 }
   0x6   :  { %150 = vmatpush.msrb.mxu1 %v129_v6  ;;  %94 = vmatpush.msra.mxu2 %v76_v14  ;;  %v167_v21 = vld [vmem:[%s1017_s1] sm:$0xff]  ;;  %v262_v23 = vld [vmem:[%s1017_s1 + $0x8] sm:$0xff]  ;;  %v263_v24 = vld [vmem:[%s1017_s1 + $0x10] sm:$0xff] }
   0x7   :  { %257 = vrot.lane.b32.xlu1 %v255_v9, %s757_s30  ;;  %163 = vrot.lane.b32.xlu0 %v161_v10, %s758_s4  ;;  %v102_v32 = vld [vmem:[%s1015_s2 + $0x38] sm:$0xff]  ;;  %v101_v33 = vld [vmem:[%s1015_s2 + $0x30] sm:$0xff] }
   0x8   :  { %151 = vmatpush.msrb.mxu1 %v128_v8  ;;  %95 = vmatpush.msra.mxu2 %v75_v15  ;;  %v100_v49 = vld [vmem:[%s1016_s0 + $0x20] sm:$0xff]  ;;  %v197_v50 = vld [vmem:[%s1017_s1 + $0x48] sm:$0xff]  ;;  %v372_v55 = vld [vmem:[%s1017_s1 + $0x18] sm:$0xff] }
   0x9   :  { %706 = vmatmul.msk.f32.vlgmr.msra.gmra.mxu2 %vm18_vm0, %v74_v16  ;;  %120 = vmatpush.msra.mxu3 %v102_v32  ;;  %v373_v56 = vld [vmem:[%s1017_s1 + $0x20] sm:$0xff]  ;;  %v305_v61 = vld [vmem:[%s1017_s1 + $0x50] sm:$0xff]  ;;  %v421_v0 = vld [vmem:[%s1017_s1 + $0x38] sm:$0xff] }
   0xa   :  { %v422_v1 = vld [vmem:[%s1017_s1 + $0x40] sm:$0xff]  ;;  %v620_v2 = vld [vmem:[%s1017_s1 + $0x30] sm:$0xff]  ;;  %v229_v3 = vld [vmem:[%s1015_s2 + $0x68] sm:$0xff] }
   0xb   :  { %121 = vmatpush.msra.mxu3 %v101_v33  ;;  %v228_v4 = vld [vmem:[%s1015_s2 + $0x60] sm:$0xff]  ;;  %246 = vmatpush.msrb.mxu0 %v229_v3  ;;  %v227_v5 = vld [vmem:[%s1015_s2 + $0x58] sm:$0xff]  ;;  %v226_v6 = vld [vmem:[%s1015_s2 + $0x50] sm:$0xff] }
   0xc   :  { %707 = vmatmul.msk.f32.vlgmr.msra.gmra.mxu3 %vm18_vm0, %v100_v49  ;;  %v340_v8 = vld [vmem:[%s1015_s2 + $0x88] sm:$0xff]  ;;  %v339_v10 = vld [vmem:[%s1015_s2 + $0x80] sm:$0xff]  ;;  %v337_v15 = vld [vmem:[%s1015_s2 + $0x70] sm:$0xff] }
   0xd   :  { %704 = vmatmul.msk.f32.gmra.mxu0 %vm18_vm0, %v15_v11  ;;  %708 = vmatmul.msk.f32.vlgmr.msrb.gmra.mxu1 %vm18_vm0, %v126_v12  ;;  %v338_v11 = vld [vmem:[%s1015_s2 + $0x78] sm:$0xff]  ;;  %v504_v49 = vld [vmem:[%s1015_s2 + $0x90] sm:$0xff] }
   0xe   :  { %247 = vmatpush.msrb.mxu0 %v228_v4 }
  0x10   :  { %248 = vmatpush.msrb.mxu0 %v227_v5  ;;  %v160_v5 = vld [vmem:[%s1015_s2 + $0xf8] sm:$0xff] }
  0x12   :  { %249 = vmatpush.msrb.mxu0 %v226_v6 }
  0x14   :  { %356 = vmatpush.msra.mxu0 %v340_v8 }
  0x15   :  { %709 = vmatmul.msk.f32.gmra.mxu1 %vm18_vm0, %v127_v13 }
  0x16   :  { %357 = vmatpush.msra.mxu0 %v339_v10 }
  0x18   :  { %358 = vmatpush.msra.mxu0 %v338_v11 }
  0x1a   :  { %359 = vmatpush.msra.mxu0 %v337_v15 }
  0x79   :  { %v164_v30 = vpop.permute.xlu0 %163  ;;  %v258_v37 = vpop.permute.xlu1 %257 }
  0x82   :  { %v42_v17 = vpop.f32.mrf.mxu0  ;;  %v837_v18 = vpop.f32.mrf.mxu1 }
  0x83   :  { %v166_v31 = vadd.f32 %v164_v30, %v837_v18  ;;  %v260_v40 = vadd.f32 %v258_v37, %v42_v17 }
  0x8a   :  { %v45_v19 = vpop.f32.mrf.mxu0  ;;  %v839_v20 = vpop.f32.mrf.mxu1 }
  0x8b   :  { %185 = vmatpush.msrb.mxu2 %v45_v19  ;;  %v873_v38 = vpack.i.bf16 %v42_v17, %v45_v19  ;;  %v261_v42 = vadd.f32 %v258_v37, %v45_v19  ;;  %v618_v37 = vperm.slane %v804_v7, 4 }
  0x8c   :  { %v857_v25 = vpop.f32.mrf.mxu2 }
  0x8d   :  { %186 = vmatpush.msrb.mxu2 %v42_v17 }
  0x8e   :  { %710 = vmatmul.msk.f32.vlgmr.msrb.gmra.mxu2 %vm18_vm0, %v167_v21 }
  0x8f   :  { %v928_v9 = vpop.f32.mrf.mxu3 }
  0x92   :  { %v845_v22 = vpop.f32.mrf.mxu1 }
  0x93   :  { %284 = vmatpush.msra.mxu2 %v845_v22  ;;  %v737_v29 = vpack.i.bf16 %v839_v20, %v845_v22 }
  0x95   :  { %285 = vmatpush.msra.mxu2 %v839_v20 }
  0x96   :  { %713 = vmatmul.msk.f32.vlgmr.msra.gmra.mxu2 %vm18_vm0, %v262_v23 }
  0x9e   :  { %714 = vmatmul.msk.f32.gmra.mxu2 %vm18_vm0, %v263_v24 }
 0x111   :  { %v188_v26 = vpop.f32.mrf.mxu2 }
 0x112   :  { %192 = vrot.lane.b32.xlu0 %v188_v26, %s758_s4 }
 0x119   :  { %v287_v27 = vpop.f32.mrf.mxu2 }
 0x11a   :  { %295 = vrot.lane.b32.xlu2 %v287_v27, %s757_s30 }
 0x121   :  { %v290_v28 = vpop.f32.mrf.mxu2 }
 0x122   :  { %297 = vrot.lane.b32.xlu1 %v290_v28, %s757_s30 }
 0x12a   :  { %738 = vrot.lane.b32.xlu1 %v737_v29, %s757_s30 }
 0x174   :  { %v296_v39 = vpop.permute.xlu2 %295 }
 0x175   :  { %v301_v41 = vadd.f32 %v296_v39, %v260_v40 }
 0x177   :  { %v303_v45 = vmax.f32 %v301_v41, 0.0  ;;  %v619_v41 = vadd.f32 %v618_v37, %v857_v25  ;;  %v534_v25 = vld [vmem:[%s1017_s1 + $0x28] sm:$0xff] }
 0x184   :  { %v193_v34 = vpop.permute.xlu0 %192 }
 0x185   :  { %v195_v35 = vadd.f32 %v193_v34, %v166_v31 }
 0x187   :  { %v196_v36 = vmax.f32 %v195_v35, 0.0 }
 0x189   :  { %199 = vrot.lane.b32.xlu2 %v196_v36, %s757_s30  ;;  %v507_v36 = vld [vmem:[%s1015_s2 + $0xa8] sm:$0xff] }
 0x18a   :  { %523 = vmatpush.msrb.mxu2 %v507_v36 }
 0x191   :  { %743 = vrot.lane.b32.xlu2 %v873_v38, %s757_s30 }
 0x194   :  { %v298_v43 = vpop.permute.xlu1 %297 }
 0x195   :  { %v302_v44 = vadd.f32 %v298_v43, %v261_v42 }
 0x197   :  { %v304_v46 = vmax.f32 %v302_v44, 0.0  ;;  %v472_v44 = vld [vmem:[%s1017_s1 + $0x58] sm:$0xff] }
 0x199   :  { %v732_v47 = vpack.i.bf16 %v303_v45, %v304_v46 }
 0x19b   :  { %733 = vrot.lane.b32.xlu0 %v732_v47, %s758_s4 }
 0x19c   :  { %v739_v59 = vpop.permute.xlu1 %738 }
 0x19d   :  { %v740_v62 = vunpack.i.l.bf16 %v739_v59  ;;  %v741_v63 = vunpack.i.h.bf16 %v739_v59  ;;  %v566_v59 = vld [vmem:[%s1017_s1 + $0x60] sm:$0xff] }
 0x1a3   :  { %367 = vrot.lane.b32.xlu0 %v365_v48, %s759_s27 }
 0x1e3   :  { %v200_v51 = vpop.permute.xlu2 %199 }
 0x1e4   :  { %221 = vmatpush.msrb.mxu3 %v200_v51  ;;  %v646_v51 = vld [vmem:[%s1017_s1 + $0x68] sm:$0xff] }
 0x1e5   :  { %711 = vmatmul.msk.f32.vlgmr.msrb.gmra.mxu3 %vm202_vm1, %v197_v50 }
 0x1eb   :  { %v744_v52 = vpop.permute.xlu2 %743 }
 0x1ec   :  { %v745_v53 = vunpack.i.l.bf16 %v744_v52  ;;  %v746_v54 = vunpack.i.h.bf16 %v744_v52 }
 0x1ee   :  { %402 = vmatpush.msra.mxu1 %v745_v53 }
 0x1f0   :  { %403 = vmatpush.msra.mxu1 %v746_v54  ;;  %v532_v54 = vperm.slane %v804_v7, 3  ;;  %v592_v7 = vld [vmem:[%s1015_s2 + $0xc0] sm:$0xff] }
 0x1f1   :  { %717 = vmatmul.msk.f32.vlgmr.msra.gmra.mxu1 %vm18_vm0, %v372_v55 }
 0x1f2   :  { %v533_v55 = vadd.f32 %v532_v54, %v928_v9 }
 0x1f9   :  { %718 = vmatmul.msk.f32.gmra.mxu1 %vm18_vm0, %v373_v56 }
 0x20d   :  { %v734_v57 = vpop.permute.xlu0 %733 }
 0x20e   :  { %v735_v58 = vunpack.i.l.bf16 %v734_v57  ;;  %v736_v60 = vunpack.i.h.bf16 %v734_v57 }
 0x210   :  { %331 = vmatpush.msra.mxu3 %v735_v58 }
 0x212   :  { %332 = vmatpush.msra.mxu3 %v736_v60  ;;  %v593_v60 = vld [vmem:[%s1015_s2 + $0xc8] sm:$0xff] }
 0x213   :  { %715 = vmatmul.msk.f32.vlgmr.msra.gmra.mxu3 %vm18_vm0, %v305_v61  ;;  %v591_v61 = vld [vmem:[%s1015_s2 + $0xb8] sm:$0xff] }
 0x214   :  { %451 = vmatpush.msrb.mxu3 %v740_v62  ;;  %v590_v62 = vld [vmem:[%s1015_s2 + $0xb0] sm:$0xff] }
 0x215   :  { %v368_v21 = vpop.permute.xlu0 %367 }
 0x216   :  { %452 = vmatpush.msrb.mxu3 %v741_v63  ;;  %v370_v24 = vadd.f32 %v368_v21, %v839_v20  ;;  %v371_v27 = vadd.f32 %v368_v21, %v845_v22  ;;  %v506_v20 = vld [vmem:[%s1015_s2 + $0xa0] sm:$0xff]  ;;  %v505_v22 = vld [vmem:[%s1015_s2 + $0x98] sm:$0xff]  ;;  %v673_v63 = vld [vmem:[%s1015_s2 + $0xe8] sm:$0xff] }
 0x217   :  { %524 = vmatpush.msrb.mxu2 %v506_v20 }
 0x218   :  { %639 = vmatpush.msra.mxu3 %v837_v18 }
 0x219   :  { %525 = vmatpush.msrb.mxu2 %v505_v22 }
 0x21b   :  { %719 = vmatmul.msk.f32.vlgmr.msrb.gmra.mxu3 %vm18_vm0, %v421_v0  ;;  %526 = vmatpush.msrb.mxu2 %v504_v49  ;;  %v672_v0 = vld [vmem:[%s1015_s2 + $0xe0] sm:$0xff] }
 0x21d   :  { %609 = vmatpush.msra.mxu2 %v593_v60 }
 0x21f   :  { %610 = vmatpush.msra.mxu2 %v592_v7 }
 0x221   :  { %611 = vmatpush.msra.mxu2 %v591_v61 }
 0x223   :  { %720 = vmatmul.msk.f32.gmra.mxu3 %vm18_vm0, %v422_v1  ;;  %612 = vmatpush.msra.mxu2 %v590_v62  ;;  %v671_v1 = vld [vmem:[%s1015_s2 + $0xd8] sm:$0xff] }
 0x22b   :  { %726 = vmatmul.msk.f32.vlgmr.msra.gmra.mxu3 %vm202_vm1, %v620_v2  ;;  %v670_v2 = vld [vmem:[%s1015_s2 + $0xd0] sm:$0xff] }
 0x268   :  { %v223_v12 = vpop.f32.mrf.mxu3 }
 0x269   :  { %712 = vmatmul.msk.f32.vlgmr.msrb.gmra.mxu0 %vm230_vm2, %v223_v12 }
 0x26e   :  { %v405_v13 = vpop.f32.mrf.mxu1 }
 0x26f   :  { %413 = vrot.lane.b32.xlu2 %v405_v13, %s759_s27 }
 0x276   :  { %v408_v14 = vpop.f32.mrf.mxu1 }
 0x277   :  { %415 = vrot.lane.b32.xlu1 %v408_v14, %s759_s27 }
 0x296   :  { %v334_v16 = vpop.f32.mrf.mxu3 }
 0x297   :  { %716 = vmatmul.msk.f32.vlgmr.msra.gmra.mxu0 %vm230_vm2, %v334_v16 }
 0x29e   :  { %v454_v17 = vpop.f32.mrf.mxu3 }
 0x29f   :  { %462 = vrot.lane.b32.xlu1 %v454_v17, %s759_s27 }
 0x2a6   :  { %v457_v18 = vpop.f32.mrf.mxu3 }
 0x2a7   :  { %464 = vrot.lane.b32.xlu0 %v457_v18, %s759_s27 }
 0x2ae   :  { %v641_v39 = vpop.f32.mrf.mxu3 }
 0x2af   :  { %753 = vrot.lane.b32.xlu0 %v873_v38, %s759_s27  ;;  %v644_v45 = vadd.f32 %v641_v39, %v619_v41 }
 0x2b1   :  { %v645_v48 = vmax.f32 %v644_v45, 0.0 }
 0x2c9   :  { %v414_v23 = vpop.permute.xlu2 %413 }
 0x2ca   :  { %v419_v28 = vadd.f32 %v414_v23, %v370_v24 }
 0x2e6   :  { %v251_v50 = vpop.f32.mrf.mxu0 }
 0x2e7   :  { %v254_v8 = vadd.f32 %v251_v50, %v160_v5 }
 0x2e9   :  { %v416_v19 = vpop.permute.xlu1 %415 }
 0x2ea   :  { %v420_v29 = vadd.f32 %v416_v19, %v371_v27 }
 0x311   :  { %v463_v26 = vpop.permute.xlu1 %462 }
 0x312   :  { %v468_v30 = vadd.f32 %v463_v26, %v419_v28 }
 0x314   :  { %v470_v33 = vmax.f32 %v468_v30, 0.0  ;;  %v361_v52 = vpop.f32.mrf.mxu0 }
 0x315   :  { %v364_v9 = vadd.f32 %v361_v52, %v254_v8 }
 0x319   :  { %v465_v31 = vpop.permute.xlu0 %464 }
 0x31a   :  { %v469_v32 = vadd.f32 %v465_v31, %v420_v29 }
 0x31c   :  { %v471_v34 = vmax.f32 %v469_v32, 0.0 }
 0x31e   :  { %v747_v35 = vpack.i.bf16 %v470_v33, %v471_v34 }
 0x320   :  { %748 = vrot.lane.b32.xlu2 %v747_v35, %s759_s27 }
 0x321   :  { %v754_v42 = vpop.permute.xlu0 %753 }
 0x322   :  { %v755_v46 = vunpack.i.l.bf16 %v754_v42  ;;  %v756_v47 = vunpack.i.h.bf16 %v754_v42 }
 0x37a   :  { %v749_v38 = vpop.permute.xlu2 %748 }
 0x37b   :  { %v750_v40 = vunpack.i.l.bf16 %v749_v38  ;;  %v751_v43 = vunpack.i.h.bf16 %v749_v38 }
 0x37d   :  { %498 = vmatpush.msrb.mxu0 %v750_v40 }
 0x37f   :  { %499 = vmatpush.msrb.mxu0 %v751_v43 }
 0x380   :  { %721 = vmatmul.msk.f32.vlgmr.msrb.gmra.mxu0 %vm18_vm0, %v472_v44 }
 0x381   :  { %558 = vmatpush.msra.mxu0 %v755_v46 }
 0x383   :  { %559 = vmatpush.msra.mxu0 %v756_v47 }
 0x385   :  { %665 = vmatpush.msrb.mxu0 %v645_v48 }
 0x388   :  { %723 = vmatmul.msk.f32.vlgmr.msra.gmra.mxu0 %vm18_vm0, %v534_v25 }
 0x390   :  { %727 = vmatmul.msk.f32.vlgmr.msrb.gmra.mxu0 %vm202_vm1, %v646_v51 }
 0x3fd   :  { %v501_v53 = vpop.f32.mrf.mxu0 }
 0x3fe   :  { %722 = vmatmul.msk.f32.vlgmr.msrb.gmra.mxu2 %vm230_vm2, %v501_v53 }
 0x405   :  { %v561_v56 = vpop.f32.mrf.mxu0 }
 0x406   :  { %v564_v57 = vadd.f32 %v561_v56, %v533_v55 }
 0x408   :  { %v565_v58 = vmax.f32 %v564_v57, 0.0 }
 0x40a   :  { %585 = vmatpush.msrb.mxu1 %v565_v58 }
 0x40b   :  { %724 = vmatmul.msk.f32.vlgmr.msrb.gmra.mxu1 %vm202_vm1, %v566_v59 }
 0x40c   :  { %689 = vmatpush.msra.mxu1 %v673_v63 }
 0x40d   :  { %v667_v3 = vpop.f32.mrf.mxu0 }
 0x40e   :  { %690 = vmatpush.msra.mxu1 %v672_v0 }
 0x410   :  { %691 = vmatpush.msra.mxu1 %v671_v1 }
 0x412   :  { %692 = vmatpush.msra.mxu1 %v670_v2 }
 0x413   :  { %728 = vmatmul.msk.f32.vlgmr.msra.gmra.mxu1 %vm230_vm2, %v667_v3 }
 0x481   :  { %v528_v6 = vpop.f32.mrf.mxu2 }
 0x482   :  { %v531_v10 = vadd.f32 %v528_v6, %v364_v9 }
 0x488   :  { %v587_v4 = vpop.f32.mrf.mxu1 }
 0x489   :  { %725 = vmatmul.msk.f32.vlgmr.msra.gmra.mxu2 %vm230_vm2, %v587_v4 }
 0x490   :  { %v694_v12 = vpop.f32.mrf.mxu1 }
 0x50c   :  { %v614_v11 = vpop.f32.mrf.mxu2 }
 0x50d   :  { %v617_v13 = vadd.f32 %v614_v11, %v531_v10 }
 0x50f   :  { %v697_v14 = vadd.f32 %v694_v12, %v617_v13 }
 0x511   :  { %698 = vst [vmem:[%s1018_s3] sm:$0xff] %v697_v14 }

</bundles_post_ra>
